<compile_context>
chip_gen: v7x
topology: tpu7x:2x2x1
jax: 0.10.0
libtpu: 0.0.40
codegen_flags: <defaults>
</compile_context>

<pallas_src>
import jax
import jax.numpy as jnp
from jax import lax
from jax.experimental import pallas as pl
from jax.experimental.pallas import tpu as pltpu


def mlp_kernel(x_ref, w1_ref, b1_ref, w2_ref, b2_ref, w3_ref, b3_ref,
               w4_ref, b4_ref, o_ref):
    # x_ref: (TM, 9) float32, natural row-major layout.
    xb = x_ref[...].astype(jnp.bfloat16)                              # (TM, 9)

    # layer1: w1 (64, 9) contracted with x (TM, 9) on their last dims -> (64, TM).
    # "NT" matmul (like q @ k^T): no wrapper-side or in-kernel transpose of x.
    h1 = lax.dot_general(w1_ref[...], xb, (((1,), (1,)), ((), ())),
                         preferred_element_type=jnp.float32)
    h1 = jnp.maximum(h1 + b1_ref[...], 0.0).astype(jnp.bfloat16)      # (64, TM)

    # layer2: (256, 64) @ (64, TM) -> (256, TM); bias+ReLU+cast fused, stored once as bf16.
    h2 = jnp.dot(w2_ref[...], h1, preferred_element_type=jnp.float32)
    h2 = jnp.maximum(h2 + b2_ref[...], 0.0).astype(jnp.bfloat16)      # (256, TM)

    # layer3: (64, 256) @ (256, TM) -> (64, TM)
    h3 = jnp.dot(w3_ref[...], h2, preferred_element_type=jnp.float32)
    h3 = jnp.maximum(h3 + b3_ref[...], 0.0)                           # (64, TM) f32

    # layer4: (1, 64) @ (64, TM) -> (1, TM), lane-dense output.
    out = jnp.dot(w4_ref[...], h3, preferred_element_type=jnp.float32)
    o_ref[...] = (out + b4_ref[...]).astype(o_ref.dtype)


def _round_up(n, m):
    return ((n + m - 1) // m) * m


def simple_conv_net_forward(x, params, tm=4096):
    """x: [B, 9] float32.  params hold torch-convention [out, in] weights."""
    B = x.shape[0]
    w1, b1 = params["w1"], params["b1"]   # [64, 9],   [64, 1]
    w2, b2 = params["w2"], params["b2"]   # [256, 64], [256, 1]
    w3, b3 = params["w3"], params["b3"]   # [64, 256], [64, 1]
    w4, b4 = params["w4"], params["b4"]   # [1, 64],   [1, 1]

    # bf16 operands for the MXU (f32 accumulation happens in-kernel).
    w1b = w1.astype(jnp.bfloat16)
    w2b = w2.astype(jnp.bfloat16)
    w3b = w3.astype(jnp.bfloat16)

    # Batch tile: a multiple of 128 lanes, never larger than the 128-rounded batch.
    b_eff = _round_up(B, 128)
    tm = max(128, min(_round_up(tm, 128), b_eff))
    # Give the "parallel" batch axis >= 2 grid steps when there is enough batch to
    # split (so both TensorCores on v7x get work).
    if b_eff >= 256 and pl.cdiv(B, tm) < 2:
        tm = _round_up(pl.cdiv(b_eff, 2), 128)
    if pl.cdiv(B, tm) == 1:
        # Single tile: use exact array extents (no boundary padding/masking at all).
        tm = B
    grid = (pl.cdiv(B, tm),)

    # Weights/biases: full blocks, constant index_map -> grid-resident, one DMA.
    def const_spec(a):
        return pl.BlockSpec(a.shape, lambda i: (0,) * a.ndim)

    flops = 2 * B * (9 * 64 + 64 * 256 + 256 * 64 + 64 * 1)
    param_bytes = sum(int(a.size) * a.dtype.itemsize
                      for a in (w1b, b1, w2b, b2, w3b, b3, w4, b4))
    bytes_accessed = int(x.size) * x.dtype.itemsize + B * 4 + param_bytes

    out_T = pl.pallas_call(
        mlp_kernel,
        out_shape=jax.ShapeDtypeStruct((1, B), jnp.float32),
        grid=grid,
        in_specs=[
            pl.BlockSpec((tm, 9), lambda i: (i, 0)),    # x tiled along batch rows
            const_spec(w1b), const_spec(b1),
            const_spec(w2b), const_spec(b2),
            const_spec(w3b), const_spec(b3),
            const_spec(w4), const_spec(b4),
        ],
        out_specs=pl.BlockSpec((1, tm), lambda i: (0, i)),
        compiler_params=pltpu.CompilerParams(
            dimension_semantics=("parallel",),
            vmem_limit_bytes=48 * 1024 * 1024),
        cost_estimate=pl.CostEstimate(
            flops=flops, transcendentals=0, bytes_accessed=bytes_accessed),
    )(x, w1b, b1, w2b, b2, w3b, b3, w4, b4)

    # (1, B) -> (B, 1), torch layout.
    return out_T.T


def init_params(key):
    """Deterministic init, matching torch nn.Linear's [out, in] convention."""
    def linear(key, in_f, out_f):
        kw, kb = jax.random.split(key)
        bound = 1.0 / jnp.sqrt(in_f)
        w = jax.random.uniform(kw, (out_f, in_f), jnp.float32, -bound, bound)
        b = jax.random.uniform(kb, (out_f, 1), jnp.float32, -bound, bound)
        return w, b

    k1, k2, k3, k4 = jax.random.split(key, 4)
    w1, b1 = linear(k1, 9, 64)
    w2, b2 = linear(k2, 64, 256)
    w3, b3 = linear(k3, 256, 64)
    w4, b4 = linear(k4, 64, 1)
    return {"w1": w1, "b1": b1, "w2": w2, "b2": b2,
            "w3": w3, "b3": b3, "w4": w4, "b4": b4}


if __name__ == "__main__":
    key = jax.random.PRNGKey(0)
    k_params, k_x = jax.random.split(key)

    params = init_params(k_params)
    B = 8
    x = jax.random.normal(k_x, (B, 9), jnp.float32)

    out = simple_conv_net_forward(x, params)
    jax.block_until_ready(out)

    # Pure-JAX reference (standard [B, F] layout) mirroring the kernel's bf16
    # casting so tolerances stay tight.
    w1b = params["w1"].astype(jnp.bfloat16)
    w2b = params["w2"].astype(jnp.bfloat16)
    w3b = params["w3"].astype(jnp.bfloat16)
    b1, b2, b3, b4 = params["b1"], params["b2"], params["b3"], params["b4"]
    w4 = params["w4"]

    xb = x.astype(jnp.bfloat16)
    h1 = jnp.maximum(jnp.dot(xb, w1b.T, preferred_element_type=jnp.float32)
                     + b1.T, 0.0).astype(jnp.bfloat16)
    h2 = jnp.maximum(jnp.dot(h1, w2b.T, preferred_element_type=jnp.float32)
                     + b2.T, 0.0).astype(jnp.bfloat16)
    h3 = jnp.maximum(jnp.dot(h2, w3b.T, preferred_element_type=jnp.float32)
                     + b3.T, 0.0)
    ref = jnp.dot(h3, w4.T, preferred_element_type=jnp.float32) + b4.T

    assert out.shape == (B, 1), out.shape
    err = float(jnp.max(jnp.abs(out - ref)))
    assert jnp.allclose(out, ref, atol=1e-2, rtol=1e-2), err

    print("KERNEL_OK")
</pallas_src>

<mosaic_0001>
module attributes {stable_mosaic.version = 11 : i64} {
  func.func @mlp_kernel(%arg0: i32, %arg1: memref<8x9xf32, #tpu.memory_space<vmem>>, %arg2: memref<64x9xbf16, #tpu.memory_space<vmem>>, %arg3: memref<64x1xf32, #tpu.memory_space<vmem>>, %arg4: memref<256x64xbf16, #tpu.memory_space<vmem>>, %arg5: memref<256x1xf32, #tpu.memory_space<vmem>>, %arg6: memref<64x256xbf16, #tpu.memory_space<vmem>>, %arg7: memref<64x1xf32, #tpu.memory_space<vmem>>, %arg8: memref<1x64xf32, #tpu.memory_space<vmem>>, %arg9: memref<1x1xf32, #tpu.memory_space<vmem>>, %arg10: memref<1x8xf32, #tpu.memory_space<vmem>>) attributes {dimension_semantics = [#tpu.dimension_semantics<parallel>], iteration_bounds = array<i64: 1>, scalar_prefetch = 0 : i64, scratch_operands = 0 : i64, tpu.core_type = #tpu.core_type<tc>, window_params = [{transform_indices = @transform_0, window_bounds = array<i64: 8, 9>}, {pipeline_mode = #tpu.pipeline_mode<synchronous>, transform_indices = @transform_1, window_bounds = array<i64: 64, 9>}, {pipeline_mode = #tpu.pipeline_mode<synchronous>, transform_indices = @transform_2, window_bounds = array<i64: 64, 1>}, {pipeline_mode = #tpu.pipeline_mode<synchronous>, transform_indices = @transform_3, window_bounds = array<i64: 256, 64>}, {pipeline_mode = #tpu.pipeline_mode<synchronous>, transform_indices = @transform_4, window_bounds = array<i64: 256, 1>}, {pipeline_mode = #tpu.pipeline_mode<synchronous>, transform_indices = @transform_5, window_bounds = array<i64: 64, 256>}, {pipeline_mode = #tpu.pipeline_mode<synchronous>, transform_indices = @transform_6, window_bounds = array<i64: 64, 1>}, {pipeline_mode = #tpu.pipeline_mode<synchronous>, transform_indices = @transform_7, window_bounds = array<i64: 1, 64>}, {pipeline_mode = #tpu.pipeline_mode<synchronous>, transform_indices = @transform_8, window_bounds = array<i64: 1, 1>}, {transform_indices = @transform_9, window_bounds = array<i64: 1, 8>}]} {
    %c0 = arith.constant 0 : index
    %c0_0 = arith.constant 0 : index
    %0 = vector.load %arg1[%c0, %c0_0] : memref<8x9xf32, #tpu.memory_space<vmem>>, vector<8x9xf32>
    %1 = arith.truncf %0 : vector<8x9xf32> to vector<8x9xbf16>
    %c0_1 = arith.constant 0 : index
    %c0_2 = arith.constant 0 : index
    %2 = vector.load %arg2[%c0_1, %c0_2] : memref<64x9xbf16, #tpu.memory_space<vmem>>, vector<64x9xbf16>
    %cst = arith.constant dense<0.000000e+00> : vector<64x8xf32>
    %3 = tpu.matmul %2, %1, %cst {dimension_numbers = #tpu.dot_dimension_numbers<[1], [1], [0], [0], [0, 0, 1, 0], [], []>} : vector<64x9xbf16>, vector<8x9xbf16>, vector<64x8xf32> -> vector<64x8xf32>
    %c0_3 = arith.constant 0 : index
    %c0_4 = arith.constant 0 : index
    %4 = vector.load %arg3[%c0_3, %c0_4] : memref<64x1xf32, #tpu.memory_space<vmem>>, vector<64x1xf32>
    %5 = vector.broadcast %4 : vector<64x1xf32> to vector<64x8xf32>
    %6 = arith.addf %3, %5 : vector<64x8xf32>
    %cst_5 = arith.constant 0.000000e+00 : f32
    %7 = vector.broadcast %cst_5 : f32 to vector<64x8xf32>
    %8 = arith.maximumf %6, %7 : vector<64x8xf32>
    %9 = arith.truncf %8 : vector<64x8xf32> to vector<64x8xbf16>
    %c0_6 = arith.constant 0 : index
    %c0_7 = arith.constant 0 : index
    %10 = vector.load %arg4[%c0_6, %c0_7] : memref<256x64xbf16, #tpu.memory_space<vmem>>, vector<256x64xbf16>
    %cst_8 = arith.constant dense<0.000000e+00> : vector<256x8xf32>
    %11 = tpu.matmul %10, %9, %cst_8 {dimension_numbers = #tpu.dot_dimension_numbers<[1], [0], [0], [1], [0, 0, 1, 1], [], []>} : vector<256x64xbf16>, vector<64x8xbf16>, vector<256x8xf32> -> vector<256x8xf32>
    %c0_9 = arith.constant 0 : index
    %c0_10 = arith.constant 0 : index
    %12 = vector.load %arg5[%c0_9, %c0_10] : memref<256x1xf32, #tpu.memory_space<vmem>>, vector<256x1xf32>
    %13 = vector.broadcast %12 : vector<256x1xf32> to vector<256x8xf32>
    %14 = arith.addf %11, %13 : vector<256x8xf32>
    %cst_11 = arith.constant 0.000000e+00 : f32
    %15 = vector.broadcast %cst_11 : f32 to vector<256x8xf32>
    %16 = arith.maximumf %14, %15 : vector<256x8xf32>
    %17 = arith.truncf %16 : vector<256x8xf32> to vector<256x8xbf16>
    %c0_12 = arith.constant 0 : index
    %c0_13 = arith.constant 0 : index
    %18 = vector.load %arg6[%c0_12, %c0_13] : memref<64x256xbf16, #tpu.memory_space<vmem>>, vector<64x256xbf16>
    %cst_14 = arith.constant dense<0.000000e+00> : vector<64x8xf32>
    %19 = tpu.matmul %18, %17, %cst_14 {dimension_numbers = #tpu.dot_dimension_numbers<[1], [0], [0], [1], [0, 0, 1, 1], [], []>} : vector<64x256xbf16>, vector<256x8xbf16>, vector<64x8xf32> -> vector<64x8xf32>
    %c0_15 = arith.constant 0 : index
    %c0_16 = arith.constant 0 : index
    %20 = vector.load %arg7[%c0_15, %c0_16] : memref<64x1xf32, #tpu.memory_space<vmem>>, vector<64x1xf32>
    %21 = vector.broadcast %20 : vector<64x1xf32> to vector<64x8xf32>
    %22 = arith.addf %19, %21 : vector<64x8xf32>
    %cst_17 = arith.constant 0.000000e+00 : f32
    %23 = vector.broadcast %cst_17 : f32 to vector<64x8xf32>
    %24 = arith.maximumf %22, %23 : vector<64x8xf32>
    %c0_18 = arith.constant 0 : index
    %c0_19 = arith.constant 0 : index
    %25 = vector.load %arg8[%c0_18, %c0_19] : memref<1x64xf32, #tpu.memory_space<vmem>>, vector<1x64xf32>
    %cst_20 = arith.constant dense<0.000000e+00> : vector<1x8xf32>
    %26 = tpu.matmul %25, %24, %cst_20 {dimension_numbers = #tpu.dot_dimension_numbers<[1], [0], [0], [1], [0, 0, 1, 1], [], []>} : vector<1x64xf32>, vector<64x8xf32>, vector<1x8xf32> -> vector<1x8xf32>
    %c0_21 = arith.constant 0 : index
    %c0_22 = arith.constant 0 : index
    %27 = vector.load %arg9[%c0_21, %c0_22] : memref<1x1xf32, #tpu.memory_space<vmem>>, vector<1x1xf32>
    %28 = vector.broadcast %27 : vector<1x1xf32> to vector<1x8xf32>
    %29 = arith.addf %26, %28 : vector<1x8xf32>
    %c0_23 = arith.constant 0 : index
    %c0_24 = arith.constant 0 : index
    %30 = vector.load %arg10[%c0_23, %c0_24] : memref<1x8xf32, #tpu.memory_space<vmem>>, vector<1x8xf32>
    tpu.vector_store %arg10[%c0_23, %c0_24], %29 {strides = array<i32>} : memref<1x8xf32, #tpu.memory_space<vmem>>, vector<1x8xf32>,
    return
  }
  func.func @transform_0(%arg0: i32) -> (i32, i32) {
    %c0_i32 = arith.constant 0 : i32
    %c0_i32_0 = arith.constant 0 : i32
    return %arg0, %c0_i32 : i32, i32
  }
  func.func @transform_1(%arg0: i32) -> (i32, i32) {
    %c0_i32 = arith.constant 0 : i32
    %c0_i32_0 = arith.constant 0 : i32
    %c0_i32_1 = arith.constant 0 : i32
    return %c0_i32, %c0_i32_0 : i32, i32
  }
  func.func @transform_2(%arg0: i32) -> (i32, i32) {
    %c0_i32 = arith.constant 0 : i32
    %c0_i32_0 = arith.constant 0 : i32
    %c0_i32_1 = arith.constant 0 : i32
    return %c0_i32, %c0_i32_0 : i32, i32
  }
  func.func @transform_3(%arg0: i32) -> (i32, i32) {
    %c0_i32 = arith.constant 0 : i32
    %c0_i32_0 = arith.constant 0 : i32
    %c0_i32_1 = arith.constant 0 : i32
    return %c0_i32, %c0_i32_0 : i32, i32
  }
  func.func @transform_4(%arg0: i32) -> (i32, i32) {
    %c0_i32 = arith.constant 0 : i32
    %c0_i32_0 = arith.constant 0 : i32
    %c0_i32_1 = arith.constant 0 : i32
    return %c0_i32, %c0_i32_0 : i32, i32
  }
  func.func @transform_5(%arg0: i32) -> (i32, i32) {
    %c0_i32 = arith.constant 0 : i32
    %c0_i32_0 = arith.constant 0 : i32
    %c0_i32_1 = arith.constant 0 : i32
    return %c0_i32, %c0_i32_0 : i32, i32
  }
  func.func @transform_6(%arg0: i32) -> (i32, i32) {
    %c0_i32 = arith.constant 0 : i32
    %c0_i32_0 = arith.constant 0 : i32
    %c0_i32_1 = arith.constant 0 : i32
    return %c0_i32, %c0_i32_0 : i32, i32
  }
  func.func @transform_7(%arg0: i32) -> (i32, i32) {
    %c0_i32 = arith.constant 0 : i32
    %c0_i32_0 = arith.constant 0 : i32
    %c0_i32_1 = arith.constant 0 : i32
    return %c0_i32, %c0_i32_0 : i32, i32
  }
  func.func @transform_8(%arg0: i32) -> (i32, i32) {
    %c0_i32 = arith.constant 0 : i32
    %c0_i32_0 = arith.constant 0 : i32
    %c0_i32_1 = arith.constant 0 : i32
    return %c0_i32, %c0_i32_0 : i32, i32
  }
  func.func @transform_9(%arg0: i32) -> (i32, i32) {
    %c0_i32 = arith.constant 0 : i32
    %c0_i32_0 = arith.constant 0 : i32
    return %c0_i32, %arg0 : i32, i32
  }
}

</mosaic_0001>

<bundles_post_ra>
// kernel: tpu_custom_call.1
= control target key start
LH: loop header
LB: loop body
LE: loop exit
PB: predicated region body
PF: predicated region fallthrough
CT: control target
= control target key end

     0   :  { %s1705_s0 = inlined_call_operand.vmem [shape: f32[8,9], index: 0, kind: input, shape index: {}]   ;;  %s1706_s1 = inlined_call_operand.vmem [shape: bf16[64,9], index: 1, kind: input, shape index: {}]   ;;  %s1707_s2 = inlined_call_operand.vmem [shape: f32[64,1], index: 2, kind: input, shape index: {}]   ;;  %s1708_s3 = inlined_call_operand.vmem [shape: bf16[256,64], index: 3, kind: input, shape index: {}]   ;;  %s1709_s4 = inlined_call_operand.vmem [shape: f32[256,1], index: 4, kind: input, shape index: {}]   ;;  %s1710_s5 = inlined_call_operand.vmem [shape: bf16[64,256], index: 5, kind: input, shape index: {}]   ;;  %s1711_s6 = inlined_call_operand.vmem [shape: f32[64,1], index: 6, kind: input, shape index: {}]   ;;  %s1712_s7 = inlined_call_operand.vmem [shape: f32[1,64], index: 7, kind: input, shape index: {}]   ;;  %s1713_s8 = inlined_call_operand.<no memory space> [shape: f32[1,1], index: 8, kind: input, shape index: {}]   ;;  %s1714_s9 = inlined_call_operand.hbm [shape: f32[1,8], index: 9, kind: output, shape index: {}]  }
   0x1   :  { %v14_v0 = vstv %s1713_s8 }
   0x2   :  { %15 = vst [vmem:[#allocation2] sm:$0x1] %v14_v0 }
   0x3   :  { %v46_v1 = vld [vmem:[%s1707_s2] sm:$0xff]  ;;  %vm114_vm0 = vcmask 72704   ;;  %v48_v3 = vld [vmem:[%s1707_s2 + $0x10] sm:$0xff]  ;;  %v1306_v4 = vmov 0   ;;  %v47_v6 = vld [vmem:[%s1707_s2 + $0x8] sm:$0xff] }
   0x4   :  { %v36_v2 = vld [vmem:[%s1705_s0] sm:$0xff]  ;;  %1248 = vset.pattern.permute.xlu0 %v1306_v4  ;;  %1249 = vset.pattern.permute.xlu1 %v1306_v4  ;;  %v49_v9 = vld [vmem:[%s1707_s2 + $0x18] sm:$0xff]  ;;  %v1251_v11 = vld [vmem:[%s1706_s1 + $0x8] sm:$0xff]  }
   0x5   :  { %v37_v5 = vpack.c.bf16 %v36_v2, %v36_v2  ;;  %56 = vperm.xlu0 %1248, %v46_v1   ;;  %66 = vperm.xlu1 %1249, %v48_v3   ;;  %v1250_v7 = vld [vmem:[%s1706_s1] sm:$0xff]   ;;  %v51_v12 = vld [vmem:[%s1707_s2 + $0x28] sm:$0xff]  ;;  %v1252_v13 = vld [vmem:[%s1706_s1 + $0x10] sm:$0xff]  }
   0x6   :  { %1163 = vmatprep.mubr.msk.bf16.mxu0 %vm114_vm0, %v1250_v7  ;;  %v50_v10 = vld [vmem:[%s1707_s2 + $0x20] sm:$0xff]  ;;  %v52_v14 = vld [vmem:[%s1707_s2 + $0x30] sm:$0xff]  ;;  %v53_v15 = vld [vmem:[%s1707_s2 + $0x38] sm:$0xff] }
   0x7   :  { %1242 = vmatprep.subr.msk.bf16.mxu0 %vm114_vm0, %v37_v5  ;;  %v128_v8 = vsel %vm114_vm0, %v37_v5, 0  ;;  %v255_v16 = vld [vmem:[%s1709_s4 + $0x80] sm:$0xff]  ;;  %v1253_v17 = vld [vmem:[%s1706_s1 + $0x18] sm:$0xff]   ;;  %v256_v18 = vld [vmem:[%s1709_s4 + $0x88] sm:$0xff] }
   0x8   :  { %1162 = vmatpush3.bf16.xpose.msra.mxu0 %v128_v8  ;;  %v239_v19 = vld [vmem:[%s1709_s4] sm:$0xff]  ;;  %v240_v20 = vld [vmem:[%s1709_s4 + $0x8] sm:$0xff]  ;;  %v257_v21 = vld [vmem:[%s1709_s4 + $0x90] sm:$0xff] }
   0x9   :  { %61 = vperm.xlu0 %1248, %v47_v6   ;;  %71 = vperm.xlu1 %1249, %v49_v9   ;;  %v258_v22 = vld [vmem:[%s1709_s4 + $0x98] sm:$0xff]  ;;  %v241_v23 = vld [vmem:[%s1709_s4 + $0x10] sm:$0xff]  ;;  %v259_v25 = vld [vmem:[%s1709_s4 + $0xa0] sm:$0xff] }
   0xa   :  { %v242_v24 = vld [vmem:[%s1709_s4 + $0x18] sm:$0xff]  ;;  %v260_v26 = vld [vmem:[%s1709_s4 + $0xa8] sm:$0xff] }
   0xd   :  { %76 = vperm.xlu0 %1248, %v50_v10   ;;  %81 = vperm.xlu1 %1249, %v51_v12  }
   0xf   :  { %1164 = vmatmul.mubr.msk.bf16.vlgmr.msra.gmra.mrb[0].mxu0 %vm114_vm0, %v1251_v11 }
  0x10   :  { %1167 = vmatprep.mubr.msk.bf16.mxu0 %vm114_vm0, %v1252_v13 }
  0x11   :  { %86 = vperm.xlu0 %1248, %v52_v14   ;;  %91 = vperm.xlu1 %1249, %v53_v15  }
  0x15   :  { %353 = vperm.xlu0 %1248, %v255_v16   ;;  %358 = vperm.xlu1 %1249, %v256_v18  }
  0x17   :  { %1168 = vmatmul.mubr.msk.bf16.gmra.mrb[4].mxu0 %vm114_vm0, %v1253_v17 }
  0x19   :  { %273 = vperm.xlu0 %1248, %v239_v19   ;;  %278 = vperm.xlu1 %1249, %v240_v20  }
  0x1d   :  { %363 = vperm.xlu0 %1248, %v257_v21   ;;  %368 = vperm.xlu1 %1249, %v258_v22  }
  0x21   :  { %283 = vperm.xlu0 %1248, %v241_v23   ;;  %288 = vperm.xlu1 %1249, %v242_v24  }
  0x25   :  { %373 = vperm.xlu0 %1248, %v259_v25   ;;  %378 = vperm.xlu1 %1249, %v260_v26  }
  0x26   :  { %16 = vsyncpa [#allocation4], 0  ;;  %v243_v27 = vld [vmem:[%s1709_s4 + $0x20] sm:$0xff]  ;;  %v244_v28 = vld [vmem:[%s1709_s4 + $0x28] sm:$0xff]  ;;  %vm511_vm1 = vcmask 523264   ;;  %vm1308_vm2 = vmmov 0  }
  0x27   :  { %v261_v29 = vld [vmem:[%s1709_s4 + $0xb0] sm:$0xff]  ;;  %v262_v30 = vld [vmem:[%s1709_s4 + $0xb8] sm:$0xff]  ;;  %v263_v33 = vld [vmem:[%s1709_s4 + $0xc0] sm:$0xff]  ;;  %s1310_s12 = smov [#allocation3]   ;;  %vm1022_vm3 = vcmask 57344  }
  0x28   :  { %v245_v31 = vld [vmem:[%s1709_s4 + $0x30] sm:$0xff]  ;;  %v246_v32 = vld [vmem:[%s1709_s4 + $0x38] sm:$0xff]  ;;  %v264_v34 = vld [vmem:[%s1709_s4 + $0xc8] sm:$0xff]  ;;  %s1030_s13 = sshll.u32 %s1310_s12, 4  ;;  %s1031_s13 = int_to_ptr.vmem [resolvable:$true] %s1030_s13 }
  0x29   :  { %293 = vperm.xlu0 %1248, %v243_v27   ;;  %298 = vperm.xlu1 %1249, %v244_v28   ;;  %v247_v35 = vld [vmem:[%s1709_s4 + $0x40] sm:$0xff]  ;;  %v248_v36 = vld [vmem:[%s1709_s4 + $0x48] sm:$0xff]  ;;  %v265_v37 = vld [vmem:[%s1709_s4 + $0xd0] sm:$0xff]  ;;  %s1282_s14 = scalar_lea.vmem %s1031_s13, 16  ;;  %s1286_s15 = scalar_lea.vmem %s1031_s13, 32 }
  0x2a   :  { %v266_v38 = vld [vmem:[%s1709_s4 + $0xd8] sm:$0xff]  ;;  %v249_v39 = vld [vmem:[%s1709_s4 + $0x50] sm:$0xff]  ;;  %v267_v41 = vld [vmem:[%s1709_s4 + $0xe0] sm:$0xff]  ;;  %p1283_p0 = scmp.ne.s32.totalorder %s1031_s13, %s1282_s14  ;;  %p1287_p1 = scmp.lt.s32.totalorder %s1031_s13, %s1031_s13 }
  0x2b   :  { %v250_v40 = vld [vmem:[%s1709_s4 + $0x58] sm:$0xff]  ;;  %v268_v42 = vld [vmem:[%s1709_s4 + $0xe8] sm:$0xff]  ;;  %v251_v43 = vld [vmem:[%s1709_s4 + $0x60] sm:$0xff]  ;;  %p1288_p2 = scmp.lt.s32.totalorder %s1286_s15, %s1282_s14 }
  0x2c   :  { %v252_v44 = vld [vmem:[%s1709_s4 + $0x68] sm:$0xff]  ;;  %v269_v45 = vld [vmem:[%s1709_s4 + $0xf0] sm:$0xff]  ;;  %v270_v46 = vld [vmem:[%s1709_s4 + $0xf8] sm:$0xff] }
  0x2d   :  { %383 = vperm.xlu0 %1248, %v261_v29   ;;  %388 = vperm.xlu1 %1249, %v262_v30   ;;  %v253_v47 = vld [vmem:[%s1709_s4 + $0x70] sm:$0xff]  ;;  %v254_v48 = vld [vmem:[%s1709_s4 + $0x78] sm:$0xff]  ;;  %v777_v49 = vld [vmem:[%s1711_s6] sm:$0xff]  ;;  %p1289_p3 = por %p1288_p2, %p1287_p1 }
  0x2e   :  { %v778_v50 = vld [vmem:[%s1711_s6 + $0x8] sm:$0xff]  ;;  %v779_v51 = vld [vmem:[%s1711_s6 + $0x10] sm:$0xff]  ;;  %v780_v52 = vld [vmem:[%s1711_s6 + $0x18] sm:$0xff] }
  0x2f   :  { %v781_v53 = vld [vmem:[%s1711_s6 + $0x20] sm:$0xff]  ;;  %v782_v54 = vld [vmem:[%s1711_s6 + $0x28] sm:$0xff]  ;;  %v783_v55 = vld [vmem:[%s1711_s6 + $0x30] sm:$0xff]  ;;  %p1290_p4 = pnand %p1289_p3, %p1283_p0 }
  0x30   :  { %v784_v56 = vld [vmem:[%s1711_s6 + $0x38] sm:$0xff]  ;;  %v939_v57 = vld [vmem:[#allocation2] sm:$0x1] }
  0x31   :  { %303 = vperm.xlu0 %1248, %v245_v31   ;;  %308 = vperm.xlu1 %1249, %v246_v32   ;;  %v1254_v58 = vld [vmem:[%s1708_s3] sm:$0xff]   ;;  %v1255_v31 = vld [vmem:[%s1708_s3 + $0x8] sm:$0xff]   ;;  %v1256_v32 = vld [vmem:[%s1708_s3 + $0x10] sm:$0xff]  }
  0x32   :  { %1179 = vmatprep.mubr.msk.bf16.mxu1 %vm511_vm1, %v1254_v58 }
  0x35   :  { %393 = vperm.xlu0 %1248, %v263_v33   ;;  %398 = vperm.xlu1 %1249, %v264_v34   ;;  %v1257_v33 = vld [vmem:[%s1708_s3 + $0x18] sm:$0xff]   ;;  %v1258_v34 = vld [vmem:[%s1708_s3 + $0x20] sm:$0xff]  }
  0x39   :  { %313 = vperm.xlu0 %1248, %v247_v35   ;;  %318 = vperm.xlu1 %1249, %v248_v36   ;;  %v1259_v35 = vld [vmem:[%s1708_s3 + $0x28] sm:$0xff]   ;;  %v1260_v36 = vld [vmem:[%s1708_s3 + $0x30] sm:$0xff]  }
  0x3d   :  { %403 = vperm.xlu0 %1248, %v265_v37   ;;  %408 = vperm.xlu1 %1249, %v266_v38   ;;  %v1261_v37 = vld [vmem:[%s1708_s3 + $0x38] sm:$0xff]   ;;  %v1262_v38 = vld [vmem:[%s1708_s3 + $0x40] sm:$0xff]  }
  0x41   :  { %323 = vperm.xlu0 %1248, %v249_v39   ;;  %328 = vperm.xlu1 %1249, %v250_v40   ;;  %v1263_v39 = vld [vmem:[%s1708_s3 + $0x48] sm:$0xff]   ;;  %v1264_v40 = vld [vmem:[%s1708_s3 + $0x50] sm:$0xff]  }
  0x45   :  { %413 = vperm.xlu0 %1248, %v267_v41   ;;  %418 = vperm.xlu1 %1249, %v268_v42   ;;  %v1265_v41 = vld [vmem:[%s1708_s3 + $0x58] sm:$0xff]   ;;  %v1266_v42 = vld [vmem:[%s1708_s3 + $0x60] sm:$0xff]  }
  0x49   :  { %333 = vperm.xlu0 %1248, %v251_v43   ;;  %338 = vperm.xlu1 %1249, %v252_v44   ;;  %v1267_v43 = vld [vmem:[%s1708_s3 + $0x68] sm:$0xff]   ;;  %v1268_v44 = vld [vmem:[%s1708_s3 + $0x70] sm:$0xff]  }
  0x4d   :  { %423 = vperm.xlu0 %1248, %v269_v45   ;;  %428 = vperm.xlu1 %1249, %v270_v46   ;;  %v1269_v45 = vld [vmem:[%s1708_s3 + $0x78] sm:$0xff]  }
  0x51   :  { %343 = vperm.xlu0 %1248, %v253_v47   ;;  %348 = vperm.xlu1 %1249, %v254_v48  }
  0x55   :  { %787 = vperm.xlu0 %1248, %v777_v49   ;;  %792 = vperm.xlu1 %1249, %v778_v50   ;;  %v1272_v50 = vld [vmem:[%s1710_s5 + $0x4] ss:$8 sps:$4 sm:$0xff]  }
  0x56   :  { %897 = vmatprep.mubr.bf16.mxu0 %v1272_v50 }
  0x59   :  { %797 = vperm.xlu0 %1248, %v779_v51   ;;  %802 = vperm.xlu1 %1249, %v780_v52  }
  0x5d   :  { %807 = vperm.xlu0 %1248, %v781_v53   ;;  %812 = vperm.xlu1 %1249, %v782_v54  }
  0x61   :  { %817 = vperm.xlu0 %1248, %v783_v55   ;;  %822 = vperm.xlu1 %1249, %v784_v56  }
  0x65   :  { %942 = vperm.xlu0 %1248, %v939_v57  }
  0x84   :  { %v57_v59 = vpop.permute.xlu0 %56  ;;  %v67_v60 = vpop.permute.xlu1 %66 }
  0x88   :  { %v62_v61 = vpop.permute.xlu0 %61  ;;  %v72_v62 = vpop.permute.xlu1 %71 }
  0x8c   :  { %v77_v2 = vpop.permute.xlu0 %76  ;;  %v82_v7 = vpop.permute.xlu1 %81 }
  0x90   :  { %v87_v14 = vpop.permute.xlu0 %86  ;;  %v92_v19 = vpop.permute.xlu1 %91 }
  0x94   :  { %v1593_v46 = vpop.permute.xlu0 %353  ;;  %v1595_v47 = vpop.permute.xlu1 %358 }
  0x98   :  { %v274_v48 = vpop.permute.xlu0 %273  ;;  %v279_v49 = vpop.permute.xlu1 %278 }
  0x9c   :  { %v1600_v51 = vpop.permute.xlu0 %363  ;;  %v1602_v52 = vpop.permute.xlu1 %368 }
  0xa0   :  { %v284_v53 = vpop.permute.xlu0 %283  ;;  %v289_v54 = vpop.permute.xlu1 %288 }
  0xa4   :  { %v1604_v55 = vpop.permute.xlu0 %373  ;;  %v1606_v56 = vpop.permute.xlu1 %378 }
  0xa8   :  { %v294_v57 = vpop.permute.xlu0 %293  ;;  %v299_v58 = vpop.permute.xlu1 %298 }
  0xe2   :  { %v1165_v63 = vpop.f32.mrb[0].mxu0 }
  0xe3   :  { %v173_v0 = vadd.f32 %v1165_v63, %v67_v60  ;;  %v164_v1 = vpop.f32.mrb[1].mxu0  ;;  %v1610_v60 = vpop.permute.xlu1 %388 }
  0xe4   :  { %v165_v3 = vadd.f32 %v164_v1, %v57_v59  ;;  %v1166_v4 = vpop.f32.mrb[2].mxu0  ;;  %v1608_v59 = vpop.permute.xlu0 %383 }
  0xe5   :  { %v176_v5 = vadd.f32 %v1166_v4, %v72_v62  ;;  %v167_v6 = vpop.f32.mrb[3].mxu0  ;;  %v197_v9 = vmax.f32 %v173_v0, 0.0 }
  0xe6   :  { %v168_v8 = vadd.f32 %v167_v6, %v62_v61  ;;  %v195_v11 = vmax.f32 %v165_v3, 0.0 }
  0xe7   :  { %v198_v10 = vmax.f32 %v176_v5, 0.0  ;;  %v309_v62 = vpop.permute.xlu1 %308 }
  0xe8   :  { %v196_v12 = vmax.f32 %v168_v8, 0.0  ;;  %v304_v61 = vpop.permute.xlu0 %303 }
  0xe9   :  { %v204_v13 = vpack.c.bf16 %v198_v10, %v197_v9 }
  0xea   :  { %v1169_v15 = vpop.f32.mrb[4].mxu0  ;;  %v203_v16 = vpack.c.bf16 %v196_v12, %v195_v11 }
  0xeb   :  { %v189_v17 = vadd.f32 %v1169_v15, %v87_v14  ;;  %v180_v18 = vpop.f32.mrb[5].mxu0  ;;  %v1614_v0 = vpop.permute.xlu1 %398 }
  0xec   :  { %v181_v20 = vadd.f32 %v180_v18, %v77_v2  ;;  %v1170_v21 = vpop.f32.mrb[6].mxu0  ;;  %1171 = vmatprep.subr.bf16.mxu1 %v203_v16  ;;  %v1612_v63 = vpop.permute.xlu0 %393 }
  0xed   :  { %v192_v22 = vadd.f32 %v1170_v21, %v92_v19  ;;  %v183_v23 = vpop.f32.mrb[7].mxu0  ;;  %1172 = vmatpush3.bf16.msra.mxu1 %v203_v16  ;;  %v201_v25 = vmax.f32 %v189_v17, 0.0 }
  0xee   :  { %v184_v24 = vadd.f32 %v183_v23, %v82_v7  ;;  %1173 = vmatprep.subr.bf16.mxu1 %v204_v13  ;;  %v199_v27 = vmax.f32 %v181_v20, 0.0 }
  0xef   :  { %v202_v26 = vmax.f32 %v192_v22, 0.0  ;;  %v319_v2 = vpop.permute.xlu1 %318 }
  0xf0   :  { %v200_v28 = vmax.f32 %v184_v24, 0.0  ;;  %v314_v1 = vpop.permute.xlu0 %313 }
  0xf1   :  { %v206_v29 = vpack.c.bf16 %v202_v26, %v201_v25  ;;  %1174 = vmatpush3.bf16.msra.mxu1 %v204_v13 }
  0xf2   :  { %v205_v30 = vpack.c.bf16 %v200_v28, %v199_v27 }
  0xf3   :  { %v1618_v4 = vpop.permute.xlu1 %408 }
  0xf4   :  { %1175 = vmatprep.subr.bf16.mxu1 %v205_v30  ;;  %v1616_v3 = vpop.permute.xlu0 %403 }
  0xf5   :  { %1176 = vmatpush3.bf16.msra.mxu1 %v205_v30 }
  0xf6   :  { %1177 = vmatprep.subr.bf16.mxu1 %v206_v29 }
  0xf7   :  { %v329_v9 = vpop.permute.xlu1 %328 }
  0xf8   :  { %v324_v5 = vpop.permute.xlu0 %323 }
  0xf9   :  { %1178 = vmatpush3.bf16.msra.mxu1 %v206_v29 }
  0xfb   :  { %v1624_v21 = vpop.permute.xlu1 %418 }
  0xfc   :  { %1180 = vmatmul.mubr.msk.bf16.vlgmr.msra.gmra.mrb[0].mxu1 %vm511_vm1, %v1255_v31  ;;  %v1620_v17 = vpop.permute.xlu0 %413 }
  0xfd   :  { %1183 = vmatprep.mubr.msk.bf16.mxu1 %vm511_vm1, %v1256_v32 }
 0x100   :  { %v334_v30 = vpop.permute.xlu0 %333 }
 0x104   :  { %1184 = vmatmul.mubr.msk.bf16.gmra.mrb[4].mxu1 %vm511_vm1, %v1257_v33 }
 0x105   :  { %1187 = vmatprep.mubr.msk.bf16.mxu1 %vm511_vm1, %v1258_v34  ;;  %v339_v34 = vpop.permute.xlu1 %338 }
 0x10c   :  { %1188 = vmatmul.mubr.msk.bf16.gmra.mrb[8].mxu1 %vm511_vm1, %v1259_v35 }
 0x10d   :  { %1191 = vmatprep.mubr.msk.bf16.mxu1 %vm511_vm1, %v1260_v36 }
 0x114   :  { %1192 = vmatmul.mubr.msk.bf16.gmra.mrb[12].mxu1 %vm511_vm1, %v1261_v37 }
 0x115   :  { %1195 = vmatprep.mubr.msk.bf16.mxu1 %vm511_vm1, %v1262_v38 }
 0x11c   :  { %1196 = vmatmul.mubr.msk.bf16.gmra.mrb[16].mxu1 %vm511_vm1, %v1263_v39 }
 0x11d   :  { %1199 = vmatprep.mubr.msk.bf16.mxu1 %vm511_vm1, %v1264_v40 }
 0x124   :  { %1200 = vmatmul.mubr.msk.bf16.gmra.mrb[20].mxu1 %vm511_vm1, %v1265_v41 }
 0x125   :  { %1203 = vmatprep.mubr.msk.bf16.mxu1 %vm511_vm1, %v1266_v42  ;;  %v1632_v42 = vpop.permute.xlu0 %423 }
 0x12c   :  { %1204 = vmatmul.mubr.msk.bf16.gmra.mrb[24].mxu1 %vm511_vm1, %v1267_v43 }
 0x12d   :  { %1207 = vmatprep.mubr.msk.bf16.mxu1 %vm511_vm1, %v1268_v44 }
 0x134   :  { %1208 = vmatmul.mubr.msk.bf16.gmra.mrb[28].mxu1 %vm511_vm1, %v1269_v45 }
 0x1cf   :  { %v1181_v6 = vpop.f32.mrb[0].mxu1 }
 0x1d0   :  { %v603_v7 = vadd.f32 %v1181_v6, %v284_v53  ;;  %v594_v8 = vpop.f32.mrb[1].mxu1 }
 0x1d1   :  { %v595_v10 = vadd.f32 %v594_v8, %v274_v48  ;;  %v1182_v11 = vpop.f32.mrb[2].mxu1 }
 0x1d2   :  { %v606_v12 = vadd.f32 %v1182_v11, %v289_v54  ;;  %v597_v13 = vpop.f32.mrb[3].mxu1  ;;  %v723_v15 = vmax.f32 %v603_v7, 0.0 }
 0x1d3   :  { %v598_v14 = vadd.f32 %v597_v13, %v279_v49  ;;  %v721_v18 = vmax.f32 %v595_v10, 0.0  ;;  %v1634_v49 = vpop.permute.xlu1 %428 }
 0x1d4   :  { %v724_v16 = vmax.f32 %v606_v12, 0.0 }
 0x1d5   :  { %v722_v19 = vmax.f32 %v598_v14, 0.0 }
 0x1d6   :  { %v1622_v20 = vpack.c.bf16 %v724_v16, %v723_v15 }
 0x1d7   :  { %v1626_v22 = vpack.c.bf16 %v722_v19, %v721_v18  ;;  %v1185_v23 = vpop.f32.mrb[4].mxu1  ;;  %v349_v10 = vpop.permute.xlu1 %348 }
 0x1d8   :  { %v619_v24 = vadd.f32 %v1185_v23, %v304_v61  ;;  %v610_v25 = vpop.f32.mrb[5].mxu1 }
 0x1d9   :  { %v611_v26 = vadd.f32 %v610_v25, %v294_v57  ;;  %v1186_v27 = vpop.f32.mrb[6].mxu1 }
 0x1da   :  { %v622_v28 = vadd.f32 %v1186_v27, %v309_v62  ;;  %v613_v29 = vpop.f32.mrb[7].mxu1  ;;  %v727_v32 = vmax.f32 %v619_v24, 0.0  ;;  %v344_v62 = vpop.permute.xlu0 %343 }
 0x1db   :  { %v614_v31 = vadd.f32 %v613_v29, %v299_v58  ;;  %v725_v35 = vmax.f32 %v611_v26, 0.0 }
 0x1dc   :  { %v728_v33 = vmax.f32 %v622_v28, 0.0 }
 0x1dd   :  { %v726_v36 = vmax.f32 %v614_v31, 0.0 }
 0x1de   :  { %v1628_v37 = vpack.c.bf16 %v728_v33, %v727_v32 }
 0x1df   :  { %v1630_v38 = vpack.c.bf16 %v726_v36, %v725_v35  ;;  %v1189_v39 = vpop.f32.mrb[8].mxu1 }
 0x1e0   :  { %v635_v40 = vadd.f32 %v1189_v39, %v324_v5  ;;  %v626_v41 = vpop.f32.mrb[9].mxu1 }
 0x1e1   :  { %v627_v43 = vadd.f32 %v626_v41, %v314_v1  ;;  %v1190_v44 = vpop.f32.mrb[10].mxu1 }
 0x1e2   :  { %v638_v45 = vadd.f32 %v1190_v44, %v329_v9  ;;  %v629_v48 = vpop.f32.mrb[11].mxu1  ;;  %v731_v53 = vmax.f32 %v635_v40, 0.0 }
 0x1e3   :  { %v630_v50 = vadd.f32 %v629_v48, %v319_v2  ;;  %v729_v57 = vmax.f32 %v627_v43, 0.0 }
 0x1e4   :  { %v732_v54 = vmax.f32 %v638_v45, 0.0 }
 0x1e5   :  { %v730_v58 = vmax.f32 %v630_v50, 0.0 }
 0x1e6   :  { %v1636_v61 = vpack.c.bf16 %v732_v54, %v731_v53 }
 0x1e7   :  { %v1638_v6 = vpack.c.bf16 %v730_v58, %v729_v57  ;;  %v1193_v5 = vpop.f32.mrb[12].mxu1 }
 0x1e8   :  { %v651_v7 = vadd.f32 %v1193_v5, %v344_v62  ;;  %v642_v8 = vpop.f32.mrb[13].mxu1 }
 0x1e9   :  { %v643_v1 = vadd.f32 %v642_v8, %v334_v30  ;;  %v1194_v11 = vpop.f32.mrb[14].mxu1 }
 0x1ea   :  { %v654_v9 = vadd.f32 %v1194_v11, %v349_v10  ;;  %v645_v12 = vpop.f32.mrb[15].mxu1  ;;  %v735_v14 = vmax.f32 %v651_v7, 0.0 }
 0x1eb   :  { %v646_v13 = vadd.f32 %v645_v12, %v339_v34  ;;  %v733_v15 = vmax.f32 %v643_v1, 0.0 }
 0x1ec   :  { %v736_v2 = vmax.f32 %v654_v9, 0.0 }
 0x1ed   :  { %v734_v16 = vmax.f32 %v646_v13, 0.0 }
 0x1ee   :  { %v1640_v18 = vpack.c.bf16 %v736_v2, %v735_v14 }
 0x1ef   :  { %v1642_v19 = vpack.c.bf16 %v734_v16, %v733_v15  ;;  %v1197_v23 = vpop.f32.mrb[16].mxu1  ;;  %v1279_v16 = vld [vmem:[%s1710_s5 + $0x34] ss:$8 sps:$4 sm:$0xff]  }
 0x1f0   :  { %v667_v24 = vadd.f32 %v1197_v23, %v1600_v51  ;;  %v658_v25 = vpop.f32.mrb[17].mxu1  ;;  %v1309_v23 = vmov 0.0  }
 0x1f1   :  { %v659_v26 = vadd.f32 %v658_v25, %v1593_v46  ;;  %v1198_v27 = vpop.f32.mrb[18].mxu1 }
 0x1f2   :  { %v670_v28 = vadd.f32 %v1198_v27, %v1602_v52  ;;  %v661_v29 = vpop.f32.mrb[19].mxu1  ;;  %v739_v31 = vmax.f32 %v667_v24, 0.0 }
 0x1f3   :  { %v662_v30 = vadd.f32 %v661_v29, %v1595_v47  ;;  %v737_v33 = vmax.f32 %v659_v26, 0.0 }
 0x1f4   :  { %v740_v32 = vmax.f32 %v670_v28, 0.0  ;;  %v788_v28 = vpop.permute.xlu0 %787 }
 0x1f5   :  { %v738_v34 = vmax.f32 %v662_v30, 0.0 }
 0x1f6   :  { %v762_v35 = vpack.c.bf16 %v740_v32, %v739_v31  ;;  %v793_v32 = vpop.permute.xlu1 %792 }
 0x1f7   :  { %v761_v36 = vpack.c.bf16 %v738_v34, %v737_v33  ;;  %v1201_v39 = vpop.f32.mrb[20].mxu1 }
 0x1f8   :  { %v683_v40 = vadd.f32 %v1201_v39, %v1608_v59  ;;  %v674_v41 = vpop.f32.mrb[21].mxu1 }
 0x1f9   :  { %v675_v51 = vadd.f32 %v674_v41, %v1604_v55  ;;  %v1202_v43 = vpop.f32.mrb[22].mxu1  ;;  %1112 = vmatprep.subr.bf16.mxu0 %v761_v36 }
 0x1fa   :  { %v686_v46 = vadd.f32 %v1202_v43, %v1610_v60  ;;  %v677_v52 = vpop.f32.mrb[23].mxu1  ;;  %1113 = vmatpush3.bf16.msra.mxu0 %v1626_v22  ;;  %v743_v44 = vmax.f32 %v683_v40, 0.0  ;;  %v798_v43 = vpop.permute.xlu0 %797 }
 0x1fb   :  { %v678_v47 = vadd.f32 %v677_v52, %v1606_v56  ;;  %1114 = vmatprep.subr.bf16.mxu0 %v762_v35  ;;  %v741_v48 = vmax.f32 %v675_v51, 0.0 }
 0x1fc   :  { %v744_v45 = vmax.f32 %v686_v46, 0.0 }
 0x1fd   :  { %v742_v50 = vmax.f32 %v678_v47, 0.0 }
 0x1fe   :  { %v764_v53 = vpack.c.bf16 %v744_v45, %v743_v44  ;;  %1115 = vmatpush3.bf16.msra.mxu0 %v1622_v20  ;;  %v803_v44 = vpop.permute.xlu1 %802 }
 0x1ff   :  { %v763_v59 = vpack.c.bf16 %v742_v50, %v741_v48  ;;  %v1205_v54 = vpop.f32.mrb[24].mxu1 }
 0x200   :  { %v699_v55 = vadd.f32 %v1205_v54, %v1616_v3  ;;  %v690_v57 = vpop.f32.mrb[25].mxu1 }
 0x201   :  { %v691_v60 = vadd.f32 %v690_v57, %v1612_v63  ;;  %v1206_v58 = vpop.f32.mrb[26].mxu1  ;;  %1116 = vmatprep.subr.bf16.mxu0 %v763_v59 }
 0x202   :  { %v702_v22 = vadd.f32 %v1206_v58, %v1618_v4  ;;  %v693_v56 = vpop.f32.mrb[27].mxu1  ;;  %1117 = vmatpush3.bf16.msra.mxu0 %v1630_v38  ;;  %v747_v5 = vmax.f32 %v699_v55, 0.0 }
 0x203   :  { %v694_v62 = vadd.f32 %v693_v56, %v1614_v0  ;;  %1118 = vmatprep.subr.bf16.mxu0 %v764_v53  ;;  %v745_v20 = vmax.f32 %v691_v60, 0.0  ;;  %v808_v60 = vpop.permute.xlu0 %807 }
 0x204   :  { %v748_v7 = vmax.f32 %v702_v22, 0.0 }
 0x205   :  { %v746_v8 = vmax.f32 %v694_v62, 0.0  ;;  %v813_v62 = vpop.permute.xlu1 %812 }
 0x206   :  { %v766_v10 = vpack.c.bf16 %v748_v7, %v747_v5  ;;  %1119 = vmatpush3.bf16.msra.mxu0 %v1628_v37 }
 0x207   :  { %v765_v3 = vpack.c.bf16 %v746_v8, %v745_v20  ;;  %v1209_v1 = vpop.f32.mrb[28].mxu1 }
 0x208   :  { %v715_v63 = vadd.f32 %v1209_v1, %v1632_v42  ;;  %v706_v11 = vpop.f32.mrb[29].mxu1 }
 0x209   :  { %v707_v4 = vadd.f32 %v706_v11, %v1620_v17  ;;  %v1210_v9 = vpop.f32.mrb[30].mxu1  ;;  %1120 = vmatprep.subr.bf16.mxu0 %v765_v3  ;;  %v1270_v17 = vld [vmem:[%s1710_s5] ss:$8 sps:$4 sm:$0xff]   ;;  %v818_v11 = vpop.permute.xlu0 %817 }
 0x20a   :  { %v718_v38 = vadd.f32 %v1210_v9, %v1634_v49  ;;  %v709_v0 = vpop.f32.mrb[31].mxu1  ;;  %1121 = vmatpush3.bf16.msra.mxu0 %v1638_v6  ;;  %v751_v13 = vmax.f32 %v715_v63, 0.0  ;;  %v1275_v49 = vld [vmem:[%s1710_s5 + $0x10] ss:$8 sps:$4 sm:$0xff]   ;;  %v1278_v6 = vld [vmem:[%s1710_s5 + $0x20] ss:$8 sps:$4 sm:$0xff]  }
 0x20b   :  { %v710_v12 = vadd.f32 %v709_v0, %v1624_v21  ;;  %1122 = vmatprep.subr.bf16.mxu0 %v766_v10  ;;  %v749_v37 = vmax.f32 %v707_v4, 0.0  ;;  %v1273_v21 = vld [vmem:[%s1710_s5 + $0x14] ss:$8 sps:$4 sm:$0xff]   ;;  %v823_v0 = vpop.permute.xlu1 %822 }
 0x20c   :  { %v752_v14 = vmax.f32 %v718_v38, 0.0 }
 0x20d   :  { %v750_v2 = vmax.f32 %v710_v12, 0.0 }
 0x20e   :  { %v768_v15 = vpack.c.bf16 %v752_v14, %v751_v13  ;;  %1123 = vmatpush3.bf16.msra.mxu0 %v1636_v61  ;;  %v1276_v61 = vld [vmem:[%s1710_s5 + $0x24] ss:$8 sps:$4 sm:$0xff]  }
 0x20f   :  { %v767_v42 = vpack.c.bf16 %v750_v2, %v749_v37  ;;  %v938_v2 = vld [vmem:[%s1712_s7] sm:$0x1] }
 0x211   :  { %1124 = vmatprep.subr.bf16.mxu0 %v767_v42 }
 0x212   :  { %1125 = vmatpush3.bf16.msra.mxu0 %v1642_v19  ;;  %v1307_v19 = vmov 0.0|0.0  }
 0x213   :  { %1126 = vmatprep.subr.bf16.mxu0 %v768_v15  ;;  %v945_v15 = vlaneseq }
 0x215   :  { %v946_v42 = vshrl.u32 %v945_v15, 7 }
 0x216   :  { %1127 = vmatpush3.bf16.msra.mxu0 %v1640_v18  ;;  %v1281_v18 = vld [vmem:[%s1710_s5 + $0x30] ss:$8 sps:$4 sm:$0xff]  }
 0x217   :  { %1230 = vmatprep.subr.bf16.mxu0 %v1307_v19 }
 0x219   :  { %898 = vmatmul.mubr.bf16.vlgmr.msra.gmra.mrb[8].mxu0 %v1270_v17  ;;  %v947_v17 = vsub.s32 0, %v946_v42 }
 0x21a   :  { %905 = vmatprep.mubr.bf16.mxu0 %v1273_v21  ;;  %v943_v21 = vpop.permute.xlu0 %942 }
 0x221   :  { %906 = vmatmul.mubr.bf16.gmra.mrb[12].mxu0 %v1275_v49  ;;  %v948_v49 = vrot.slane %v943_v21, %v947_v17 }
 0x222   :  { %913 = vmatprep.mubr.bf16.mxu0 %v1276_v61 }
 0x229   :  { %914 = vmatmul.mubr.bf16.gmra.mrb[16].mxu0 %v1278_v6 }
 0x22a   :  { %921 = vmatprep.mubr.bf16.mxu0 %v1279_v16 }
 0x231   :  { %922 = vmatmul.mubr.bf16.gmra.mrb[20].mxu0 %v1281_v18 }
 0x232   :  { %1227 = vmatprep.mubr.msk.f32.mxu0 %vm1308_vm2, %v1309_v23 }
 0x2ec   :  { %v1128_v24 = vpop.f32.mrb[8].mxu0 }
 0x2ed   :  { %v1129_v25 = vpop.f32.mrb[9].mxu0 }
 0x2ee   :  { %v1130_v26 = vadd.f32 %v1129_v25, %v1128_v24  ;;  %v1131_v27 = vpop.f32.mrb[10].mxu0 }
 0x2ef   :  { %v1132_v29 = vpop.f32.mrb[11].mxu0 }
 0x2f0   :  { %v900_v30 = vadd.f32 %v1130_v26, %v788_v28  ;;  %v1133_v31 = vadd.f32 %v1132_v29, %v1131_v27 }
 0x2f2   :  { %v903_v33 = vadd.f32 %v1133_v31, %v793_v32  ;;  %v930_v34 = vmax.f32 %v900_v30, 0.0 }
 0x2f4   :  { %v931_v35 = vmax.f32 %v903_v33, 0.0  ;;  %v1134_v36 = vpop.f32.mrb[12].mxu0 }
 0x2f5   :  { %v1135_v39 = vpop.f32.mrb[13].mxu0 }
 0x2f6   :  { %v1231_v40 = vpack.c.bf16 %v931_v35, %v930_v34  ;;  %v1136_v41 = vadd.f32 %v1135_v39, %v1134_v36  ;;  %v1137_v51 = vpop.f32.mrb[14].mxu0 }
 0x2f7   :  { %v1138_v46 = vpop.f32.mrb[15].mxu0 }
 0x2f8   :  { %v908_v52 = vadd.f32 %v1136_v41, %v798_v43  ;;  %v1139_v47 = vadd.f32 %v1138_v46, %v1137_v51  ;;  %1232 = vmatpush3.bf16.msra.mxu0 %v1231_v40 }
 0x2f9   :  { %1233 = vmatprep.subr.bf16.mxu0 %v1307_v19 }
 0x2fa   :  { %v911_v45 = vadd.f32 %v1139_v47, %v803_v44  ;;  %v932_v48 = vmax.f32 %v908_v52, 0.0 }
 0x2fc   :  { %v933_v50 = vmax.f32 %v911_v45, 0.0  ;;  %v1140_v53 = vpop.f32.mrb[16].mxu0 }
 0x2fd   :  { %v1141_v59 = vpop.f32.mrb[17].mxu0 }
 0x2fe   :  { %v1234_v54 = vpack.c.bf16 %v933_v50, %v932_v48  ;;  %v1142_v55 = vadd.f32 %v1141_v59, %v1140_v53  ;;  %v1143_v57 = vpop.f32.mrb[18].mxu0 }
 0x2ff   :  { %v1144_v58 = vpop.f32.mrb[19].mxu0 }
 0x300   :  { %v916_v22 = vadd.f32 %v1142_v55, %v808_v60  ;;  %v1145_v56 = vadd.f32 %v1144_v58, %v1143_v57  ;;  %1235 = vmatpush3.bf16.msra.mxu0 %v1234_v54 }
 0x301   :  { %1236 = vmatprep.subr.bf16.mxu0 %v1307_v19 }
 0x302   :  { %v919_v5 = vadd.f32 %v1145_v56, %v813_v62  ;;  %v934_v7 = vmax.f32 %v916_v22, 0.0 }
 0x304   :  { %v935_v20 = vmax.f32 %v919_v5, 0.0  ;;  %v1146_v8 = vpop.f32.mrb[20].mxu0 }
 0x305   :  { %v1147_v10 = vpop.f32.mrb[21].mxu0 }
 0x306   :  { %v1237_v3 = vpack.c.bf16 %v935_v20, %v934_v7  ;;  %v1148_v1 = vadd.f32 %v1147_v10, %v1146_v8  ;;  %v1149_v63 = vpop.f32.mrb[22].mxu0 }
 0x307   :  { %v1150_v4 = vpop.f32.mrb[23].mxu0 }
 0x308   :  { %v924_v9 = vadd.f32 %v1148_v1, %v818_v11  ;;  %v1151_v38 = vadd.f32 %v1150_v4, %v1149_v63  ;;  %1238 = vmatpush3.bf16.msra.mxu0 %v1237_v3 }
 0x309   :  { %1239 = vmatprep.subr.bf16.mxu0 %v1307_v19 }
 0x30a   :  { %v927_v12 = vadd.f32 %v1151_v38, %v823_v0  ;;  %v936_v13 = vmax.f32 %v924_v9, 0.0 }
 0x30c   :  { %v937_v14 = vmax.f32 %v927_v12, 0.0 }
 0x30e   :  { %v1240_v37 = vpack.c.bf16 %v937_v14, %v936_v13 }
 0x310   :  { %1241 = vmatpush3.bf16.msra.mxu0 %v1240_v37 }
 0x313   :  { %1228 = vmatmul.mubr.msk.f32.vlgmr.msra.gmra.mrb[24].mxu0 %vm511_vm1, %v938_v2 }
 0x3e6   :  { %v1018_v61 = vpop.f32.mrb[24].mxu0 }
 0x3e7   :  { %v1019_v6 = vadd.f32 %v1018_v61, %v948_v49  ;;  %v1229_v16 = vpop.f32.mrb[25].mxu0 }
 0x3e9   :  { %1023 = vst.msk [vmem:[#allocation3] sm:$0x1] %vm1022_vm3, %v1019_v6 }
 0x3ea   :  { %1293 = shalt.err (!%p1290_p4)
}
 0x3eb   :  { %s1294_s17 = scalar_lea.hbm %s1714_s9, 16 }
 0x3ec   :  { %p1295_p5 = scmp.ne.s32.totalorder %s1714_s9, %s1294_s17  ;;  %p1298_p6 = scmp.lt.u32.totalorder %s1294_s17, %s1714_s9 }
 0x3ee   :  { %p1300_p7 = pnand %p1298_p6, %p1295_p5 }
 0x3f0   :  { %1303 = shalt.err (!%p1300_p7)
}
 0x3f1   :  { %1033 = dma.vmem_to_hbm [thread:$0]  %s1031_s13, 16, %s1714_s9, [#allocation4]  }
 0x3f2   :  { %1304 = dma.done.wait [#allocation4], 16  }
 0x3f3   :  { %1305 = vsyncadd [#allocation4], 4294967280 }
 0x3f4   :  { %1037 = vsyncpa [#allocation4], 1 }

</bundles_post_ra>
